<compile_context>
chip_gen: v5e
topology: v5e:2x2
jax: 0.10.0
libtpu: 0.0.40
codegen_flags: <defaults>
</compile_context>

<pallas_src>
import math
from functools import partial

import jax
import jax.numpy as jnp
from jax.experimental import pallas as pl
from jax.experimental.pallas import tpu as pltpu

# Raised scoped-VMEM budget (weights are resident per block; default 32 MiB is
# tight for ViT-L-class shapes).  For very large models the MLP weights should
# be kept in HBM (memory_space=pl.ANY) and pipelined with pltpu.emit_pipeline.
_VMEM_LIMIT = 64 * 1024 * 1024


# ---------------------------------------------------------------------------
# Small helpers
# ---------------------------------------------------------------------------

def _const_spec(shape):
    """BlockSpec for a weight that is fully resident and constant over the grid."""
    zeros = (0,) * len(shape)
    return pl.BlockSpec(shape, lambda *_args, _z=zeros: _z)


def _layernorm_f32(x, w, b, eps=1e-5):
    mu = jnp.mean(x, axis=-1, keepdims=True)
    var = jnp.mean((x - mu) ** 2, axis=-1, keepdims=True)
    return (x - mu) * jax.lax.rsqrt(var + eps) * w + b


def _heads_major(x):
    """[M, H, D] -> [H, M, D] (lane dim D unchanged)."""
    if hasattr(pltpu, "einshape"):
        return pltpu.einshape("mhd->hmd", x)
    return jnp.transpose(x, (1, 0, 2))


def _tokens_major(x):
    """[H, M, D] -> [M, H, D]."""
    if hasattr(pltpu, "einshape"):
        return pltpu.einshape("hmd->mhd", x)
    return jnp.transpose(x, (1, 0, 2))


# ---------------------------------------------------------------------------
# Pallas kernels
# ---------------------------------------------------------------------------

def patch_embed_kernel(patches_ref, w_ref, b_ref, out_ref):
    # patches: [TM, K] (compute dtype), w: [K, E] pre-transposed, b: [1, E] f32.
    acc = jnp.dot(patches_ref[...], w_ref[...],
                  preferred_element_type=jnp.float32)
    out_ref[...] = (acc + b_ref[...]).astype(out_ref.dtype)


def attn_block_kernel(x_ref, ln1w_ref, ln1b_ref, qkvw_ref, projw_ref,
                      projb_ref, out_ref, *, num_heads):
    # x = x + proj(multi_head_attn(LN1(x)))  for one batch element.
    x = x_ref[0]                              # [N, C] (model dtype)
    xf = x.astype(jnp.float32)
    N, C = xf.shape
    hd = C // num_heads
    scale = hd ** (-0.5)
    cdt = qkvw_ref.dtype                      # matmul operand dtype (bf16/f32)

    xn = _layernorm_f32(xf, ln1w_ref[...], ln1b_ref[...])

    # Single fused QKV matmul; weight already [C, 3C] (pre-transposed).
    qkv = jnp.dot(xn.astype(cdt), qkvw_ref[...],
                  preferred_element_type=jnp.float32)          # [N, 3C] f32
    # Last-dim layout is [3][head][hd], matching torch reshape(B,N,3,H,hd).
    qkv = qkv.reshape(N, 3 * num_heads, hd)
    qkv = _heads_major(qkv)                                    # [3*nh, N, hd]
    q = qkv[:num_heads] * scale          # fold scale into q (N*hd elems)
    k = qkv[num_heads:2 * num_heads]
    v = qkv[2 * num_heads:]

    # Head-batched attention (leading batch dim -> single dot_general each).
    s = jnp.einsum("hqd,hkd->hqk", q.astype(cdt), k.astype(cdt),
                   preferred_element_type=jnp.float32)         # [nh, N, N]
    s = s - jnp.max(s, axis=-1, keepdims=True)
    p = jnp.exp(s)
    p = p * pl.reciprocal(jnp.sum(p, axis=-1, keepdims=True), approx=True)

    o = jnp.einsum("hqk,hkd->hqd", p.astype(cdt), v.astype(cdt),
                   preferred_element_type=jnp.float32)         # [nh, N, hd]
    o = _tokens_major(o).reshape(N, C)                         # [N, C]
    o = jnp.dot(o.astype(cdt), projw_ref[...],
                preferred_element_type=jnp.float32) + projb_ref[...]

    # TODO(synk): attn_drop / proj_drop / DropPath are identity at inference.
    out_ref[0] = (xf + o).astype(out_ref.dtype)


def mlp_block_kernel(x_ref, ln2w_ref, ln2b_ref, fc1w_ref, fc1b_ref,
                     fc2w_ref, fc2b_ref, out_ref):
    # x = x + fc2(gelu(fc1(LN2(x))))  for one (batch, token-tile) block.
    x = x_ref[0]                              # [TN, C]
    xf = x.astype(jnp.float32)
    cdt = fc1w_ref.dtype

    xn = _layernorm_f32(xf, ln2w_ref[...], ln2b_ref[...])
    h = jnp.dot(xn.astype(cdt), fc1w_ref[...],
                preferred_element_type=jnp.float32) + fc1b_ref[...]
    h = jax.nn.gelu(h, approximate=False)     # exact GELU (nn.GELU default)
    h = jnp.dot(h.astype(cdt), fc2w_ref[...],
                preferred_element_type=jnp.float32) + fc2b_ref[...]
    out_ref[0] = (xf + h).astype(out_ref.dtype)


# ---------------------------------------------------------------------------
# Wrappers around pallas_call
# ---------------------------------------------------------------------------

def run_patch_embed(patches, w_t, b2d, *, tile_m=256):
    M, K = patches.shape
    E = w_t.shape[1]
    tm = M if M <= tile_m else tile_m         # 256-row tiles -> pipelined DMA
    return pl.pallas_call(
        patch_embed_kernel,
        out_shape=jax.ShapeDtypeStruct((M, E), jnp.float32),
        grid=(pl.cdiv(M, tm),),
        in_specs=[pl.BlockSpec((tm, K), lambda i: (i, 0)),
                  _const_spec(w_t.shape),
                  _const_spec(b2d.shape)],
        out_specs=pl.BlockSpec((tm, E), lambda i: (i, 0)),
        compiler_params=pltpu.CompilerParams(
            dimension_semantics=("parallel",),
            vmem_limit_bytes=_VMEM_LIMIT),
    )(patches, w_t, b2d)


def run_attn(x, ln1w, ln1b, qkvw_t, projw_t, projb, *, num_heads):
    B, N, C = x.shape
    weights = (ln1w, ln1b, qkvw_t, projw_t, projb)
    in_specs = [pl.BlockSpec((1, N, C), lambda b: (b, 0, 0))]
    in_specs += [_const_spec(w.shape) for w in weights]
    return pl.pallas_call(
        partial(attn_block_kernel, num_heads=num_heads),
        out_shape=jax.ShapeDtypeStruct((B, N, C), x.dtype),
        grid=(B,),
        in_specs=in_specs,
        out_specs=pl.BlockSpec((1, N, C), lambda b: (b, 0, 0)),
        compiler_params=pltpu.CompilerParams(
            dimension_semantics=("parallel",),
            vmem_limit_bytes=_VMEM_LIMIT),
    )(x, *weights)


def run_mlp(x, ln2w, ln2b, fc1w_t, fc1b, fc2w_t, fc2b, *, tile_n=128):
    B, N, C = x.shape
    tn = N if N <= tile_n else tile_n         # token tiles (multiple of 8)
    weights = (ln2w, ln2b, fc1w_t, fc1b, fc2w_t, fc2b)
    in_specs = [pl.BlockSpec((1, tn, C), lambda b, t: (b, t, 0))]
    in_specs += [_const_spec(w.shape) for w in weights]
    return pl.pallas_call(
        mlp_block_kernel,
        out_shape=jax.ShapeDtypeStruct((B, N, C), x.dtype),
        grid=(B, pl.cdiv(N, tn)),
        in_specs=in_specs,
        out_specs=pl.BlockSpec((1, tn, C), lambda b, t: (b, t, 0)),
        compiler_params=pltpu.CompilerParams(
            dimension_semantics=("parallel", "parallel"),
            vmem_limit_bytes=_VMEM_LIMIT),
    )(x, *weights)


def prepare_block_params(blk, compute_dtype):
    """One-time layout prep: transpose weights, cast to matmul operand dtype."""
    (ln1w, ln1b, qkvw, projw, projb, ln2w, ln2b,
     fc1w, fc1b, fc2w, fc2b) = blk
    r1 = lambda a: a.reshape(1, -1).astype(jnp.float32)
    attn_p = (r1(ln1w), r1(ln1b),
              qkvw.T.astype(compute_dtype),      # [C, 3C]
              projw.T.astype(compute_dtype),     # [C, C]
              r1(projb))
    mlp_p = (r1(ln2w), r1(ln2b),
             fc1w.T.astype(compute_dtype),       # [C, hidden]
             r1(fc1b),
             fc2w.T.astype(compute_dtype),       # [hidden, C]
             r1(fc2b))
    return attn_p, mlp_p


def vit_forward(x_nchw, params, *, compute_dtype=jnp.float32):
    B, C_in, H, W = x_nchw.shape
    p = params["patch_size"]
    E = params["embed_dim"]
    Hp, Wp = H // p, W // p

    # im2col: [B,C,Hp,p,Wp,p] -> [B,Hp,Wp,C,p,p] -> [B*P, C*p*p]
    patches = x_nchw.reshape(B, C_in, Hp, p, Wp, p).transpose(0, 2, 4, 1, 3, 5)
    patches = patches.reshape(B * Hp * Wp, C_in * p * p).astype(compute_dtype)
    w_t = params["patch_w"].reshape(E, C_in * p * p).T.astype(compute_dtype)
    b2d = params["patch_b"].reshape(1, E).astype(jnp.float32)

    emb = run_patch_embed(patches, w_t, b2d).reshape(B, Hp * Wp, E)

    cls = jnp.broadcast_to(params["cls_token"], (B, 1, E)).astype(jnp.float32)
    x = jnp.concatenate([cls, emb], axis=1) + params["pos_embed"]
    x = x.astype(compute_dtype)               # residual stream in model dtype

    prepped = [prepare_block_params(blk, compute_dtype)
               for blk in params["blocks"]]
    for attn_p, mlp_p in prepped:
        x = run_attn(x, *attn_p, num_heads=params["num_heads"])
        x = run_mlp(x, *mlp_p)
    return x


# ---------------------------------------------------------------------------
# Pure-JAX f32 reference (for correctness check)
# ---------------------------------------------------------------------------

def vit_reference(x_nchw, params):
    B, C_in, H, W = x_nchw.shape
    p = params["patch_size"]
    E = params["embed_dim"]
    nh = params["num_heads"]
    Hp, Wp = H // p, W // p

    patches = x_nchw.reshape(B, C_in, Hp, p, Wp, p).transpose(0, 2, 4, 1, 3, 5)
    patches = patches.reshape(B, Hp * Wp, C_in * p * p)
    w2d = params["patch_w"].reshape(E, C_in * p * p)
    emb = patches @ w2d.T + params["patch_b"]

    cls = jnp.broadcast_to(params["cls_token"], (B, 1, E))
    x = jnp.concatenate([cls, emb], axis=1) + params["pos_embed"]

    def ln(x, w, b, eps=1e-5):
        mu = x.mean(-1, keepdims=True)
        var = ((x - mu) ** 2).mean(-1, keepdims=True)
        return (x - mu) / jnp.sqrt(var + eps) * w + b

    for (ln1w, ln1b, qkvw, projw, projb, ln2w, ln2b,
         fc1w, fc1b, fc2w, fc2b) in params["blocks"]:
        Bn, N, C = x.shape
        hd = C // nh
        xn = ln(x, ln1w, ln1b)
        qkv = xn @ qkvw.T
        qkv = qkv.reshape(Bn, N, 3, nh, hd).transpose(2, 0, 3, 1, 4)
        q, k, v = qkv[0], qkv[1], qkv[2]
        attn = jnp.einsum("bhnd,bhmd->bhnm", q, k) * (hd ** -0.5)
        attn = jax.nn.softmax(attn, axis=-1)
        o = jnp.einsum("bhnm,bhmd->bhnd", attn, v)
        o = o.transpose(0, 2, 1, 3).reshape(Bn, N, C)
        x = x + (o @ projw.T + projb)
        xn = ln(x, ln2w, ln2b)
        h = jax.nn.gelu(xn @ fc1w.T + fc1b, approximate=False)
        x = x + (h @ fc2w.T + fc2b)
    return x


# ---------------------------------------------------------------------------
# Deterministic parameter construction (PyTorch-layout shapes)
# ---------------------------------------------------------------------------

def make_params(key, *, img_size, patch_size, embed_dim, depth, num_heads,
                mlp_ratio=4.0):
    C_in = 3
    num_patches = (img_size // patch_size) ** 2
    hidden = int(embed_dim * mlp_ratio)
    keys = jax.random.split(key, 4 + depth)

    params = {
        "patch_size": patch_size,
        "embed_dim": embed_dim,
        "num_heads": num_heads,
        "patch_w": 0.02 * jax.random.normal(
            keys[0], (embed_dim, C_in, patch_size, patch_size), jnp.float32),
        "patch_b": 0.02 * jax.random.normal(keys[1], (embed_dim,), jnp.float32),
        "cls_token": 0.02 * jax.random.normal(
            keys[2], (1, 1, embed_dim), jnp.float32),
        "pos_embed": 0.02 * jax.random.normal(
            keys[3], (1, num_patches + 1, embed_dim), jnp.float32),
        "blocks": [],
    }

    for layer_id in range(depth):
        bk = jax.random.split(keys[4 + layer_id], 4)
        rescale = 1.0 / math.sqrt(2.0 * (layer_id + 1))   # fix_init_weight
        ln1w = jnp.ones((embed_dim,), jnp.float32)
        ln1b = jnp.zeros((embed_dim,), jnp.float32)
        qkvw = 0.02 * jax.random.normal(bk[0], (3 * embed_dim, embed_dim),
                                        jnp.float32)      # qkv_bias=False
        projw = (0.02 * jax.random.normal(bk[1], (embed_dim, embed_dim),
                                          jnp.float32)) * rescale
        projb = jnp.zeros((embed_dim,), jnp.float32)
        ln2w = jnp.ones((embed_dim,), jnp.float32)
        ln2b = jnp.zeros((embed_dim,), jnp.float32)
        fc1w = 0.02 * jax.random.normal(bk[2], (hidden, embed_dim), jnp.float32)
        fc1b = jnp.zeros((hidden,), jnp.float32)
        fc2w = (0.02 * jax.random.normal(bk[3], (embed_dim, hidden),
                                         jnp.float32)) * rescale
        fc2b = jnp.zeros((embed_dim,), jnp.float32)
        params["blocks"].append(
            (ln1w, ln1b, qkvw, projw, projb, ln2w, ln2b,
             fc1w, fc1b, fc2w, fc2b))
    return params


# ---------------------------------------------------------------------------
# Main
# ---------------------------------------------------------------------------

if __name__ == "__main__":
    # Small ViT: img 16x16, patch 8 -> 4 patches (+cls = 5 tokens),
    # embed_dim=32, 2 blocks, 4 heads, mlp_ratio=4.
    IMG, PATCH, EMBED, DEPTH, HEADS = 16, 8, 32, 2, 4
    B = 2

    key = jax.random.PRNGKey(0)
    k_x, k_p = jax.random.split(key)
    x = jax.random.normal(k_x, (B, 3, IMG, IMG), jnp.float32)   # NCHW input
    params = make_params(k_p, img_size=IMG, patch_size=PATCH,
                         embed_dim=EMBED, depth=DEPTH, num_heads=HEADS)

    ref = vit_reference(x, params)

    # f32 matmul-operand path: strict check against the pure-JAX reference.
    out_f32 = jax.block_until_ready(
        vit_forward(x, params, compute_dtype=jnp.float32))
    assert out_f32.shape == (B, (IMG // PATCH) ** 2 + 1, EMBED)
    assert jnp.allclose(out_f32, ref, atol=3e-3, rtol=3e-3), (
        float(jnp.max(jnp.abs(out_f32 - ref))))

    # bf16 matmul-operand path (f32 accumulation, bf16 residual stream):
    # looser tolerance, same semantics.
    out_bf16 = jax.block_until_ready(
        vit_forward(x, params, compute_dtype=jnp.bfloat16))
    out_bf16_f32 = out_bf16.astype(jnp.float32)
    assert out_bf16_f32.shape == out_f32.shape
    assert jnp.allclose(out_bf16_f32, ref, atol=5e-2, rtol=5e-2), (
        float(jnp.max(jnp.abs(out_bf16_f32 - ref))))

    # TODO(synk): dropout / DropPath / use_checkpoint are no-ops at inference
    # (eval mode, drop_path_rate=0.0) and are intentionally not implemented.
    print("KERNEL_OK")
</pallas_src>

<mosaic_0001>
module attributes {stable_mosaic.version = 11 : i64} {
  func.func @patch_embed_kernel(%arg0: i32, %arg1: memref<8x192xf32, #tpu.memory_space<vmem>>, %arg2: memref<192x32xf32, #tpu.memory_space<vmem>>, %arg3: memref<1x32xf32, #tpu.memory_space<vmem>>, %arg4: memref<8x32xf32, #tpu.memory_space<vmem>>) attributes {dimension_semantics = [#tpu.dimension_semantics<parallel>], iteration_bounds = array<i64: 1>, scalar_prefetch = 0 : i64, scratch_operands = 0 : i64, tpu.core_type = #tpu.core_type<tc>, window_params = [{transform_indices = @transform_0, window_bounds = array<i64: 8, 192>}, {pipeline_mode = #tpu.pipeline_mode<synchronous>, transform_indices = @transform_1, window_bounds = array<i64: 192, 32>}, {pipeline_mode = #tpu.pipeline_mode<synchronous>, transform_indices = @transform_2, window_bounds = array<i64: 1, 32>}, {transform_indices = @transform_3, window_bounds = array<i64: 8, 32>}]} {
    %c0 = arith.constant 0 : index
    %c0_0 = arith.constant 0 : index
    %0 = vector.load %arg1[%c0, %c0_0] : memref<8x192xf32, #tpu.memory_space<vmem>>, vector<8x192xf32>
    %c0_1 = arith.constant 0 : index
    %c0_2 = arith.constant 0 : index
    %1 = vector.load %arg2[%c0_1, %c0_2] : memref<192x32xf32, #tpu.memory_space<vmem>>, vector<192x32xf32>
    %cst = arith.constant dense<0.000000e+00> : vector<8x32xf32>
    %2 = tpu.matmul %0, %1, %cst {dimension_numbers = #tpu.dot_dimension_numbers<[1], [0], [0], [1], [0, 0, 1, 1], [], []>} : vector<8x192xf32>, vector<192x32xf32>, vector<8x32xf32> -> vector<8x32xf32>
    %c0_3 = arith.constant 0 : index
    %c0_4 = arith.constant 0 : index
    %3 = vector.load %arg3[%c0_3, %c0_4] : memref<1x32xf32, #tpu.memory_space<vmem>>, vector<1x32xf32>
    %4 = vector.broadcast %3 : vector<1x32xf32> to vector<8x32xf32>
    %5 = arith.addf %2, %4 : vector<8x32xf32>
    %c0_5 = arith.constant 0 : index
    %c0_6 = arith.constant 0 : index
    %6 = vector.load %arg4[%c0_5, %c0_6] : memref<8x32xf32, #tpu.memory_space<vmem>>, vector<8x32xf32>
    tpu.vector_store %arg4[%c0_5, %c0_6], %5 {strides = array<i32>} : memref<8x32xf32, #tpu.memory_space<vmem>>, vector<8x32xf32>,
    return
  }
  func.func @transform_0(%arg0: i32) -> (i32, i32) {
    %c0_i32 = arith.constant 0 : i32
    %c0_i32_0 = arith.constant 0 : i32
    return %arg0, %c0_i32 : i32, i32
  }
  func.func @transform_1(%arg0: i32) -> (i32, i32) {
    %c0_i32 = arith.constant 0 : i32
    %c0_i32_0 = arith.constant 0 : i32
    %c0_i32_1 = arith.constant 0 : i32
    return %c0_i32, %c0_i32_0 : i32, i32
  }
  func.func @transform_2(%arg0: i32) -> (i32, i32) {
    %c0_i32 = arith.constant 0 : i32
    %c0_i32_0 = arith.constant 0 : i32
    %c0_i32_1 = arith.constant 0 : i32
    return %c0_i32, %c0_i32_0 : i32, i32
  }
  func.func @transform_3(%arg0: i32) -> (i32, i32) {
    %c0_i32 = arith.constant 0 : i32
    %c0_i32_0 = arith.constant 0 : i32
    return %arg0, %c0_i32 : i32, i32
  }
}

</mosaic_0001>

<bundles_post_ra>
// kernel: tpu_custom_call.1
= control target key start
LH: loop header
LB: loop body
LE: loop exit
PB: predicated region body
PF: predicated region fallthrough
CT: control target
= control target key end

     0   :  { %s241_s0 = inlined_call_operand.vmem [shape: f32[8,192], index: 0, kind: input, shape index: {}]   ;;  %s242_s1 = inlined_call_operand.vmem [shape: f32[192,32], index: 1, kind: input, shape index: {}]   ;;  %s243_s2 = inlined_call_operand.vmem [shape: f32[1,32], index: 2, kind: input, shape index: {}]   ;;  %s244_s3 = inlined_call_operand.hbm [shape: f32[8,32], index: 3, kind: output, shape index: {}]  }
   0x1   :  { %v32_v0 = vld [vmem:[%s242_s1 + $0x78] sm:$0xff]  ;;  %v31_v1 = vld [vmem:[%s242_s1 + $0x70] sm:$0xff]  ;;  %v30_v2 = vld [vmem:[%s242_s1 + $0x68] sm:$0xff] }
   0x2   :  { %49 = vmatpush.msra.mxu0 %v32_v0  ;;  %v40_v3 = vld [vmem:[%s242_s1 + $0xb8] sm:$0xff]  ;;  %v29_v4 = vld [vmem:[%s242_s1 + $0x60] sm:$0xff]  ;;  %v39_v5 = vld [vmem:[%s242_s1 + $0xb0] sm:$0xff] }
   0x3   :  { %77 = vmatpush.msra.mxu1 %v40_v3  ;;  %v38_v6 = vld [vmem:[%s242_s1 + $0xa8] sm:$0xff]  ;;  %v28_v7 = vld [vmem:[%s242_s1 + $0x58] sm:$0xff]  ;;  %v37_v8 = vld [vmem:[%s242_s1 + $0xa0] sm:$0xff] }
   0x4   :  { %50 = vmatpush.msra.mxu0 %v31_v1  ;;  %v27_v9 = vld [vmem:[%s242_s1 + $0x50] sm:$0xff]  ;;  %v36_v10 = vld [vmem:[%s242_s1 + $0x98] sm:$0xff] }
   0x5   :  { %78 = vmatpush.msra.mxu1 %v39_v5 }
   0x6   :  { %51 = vmatpush.msra.mxu0 %v30_v2 }
   0x7   :  { %79 = vmatpush.msra.mxu1 %v38_v6 }
   0x8   :  { %52 = vmatpush.msra.mxu0 %v29_v4 }
   0xa   :  { %53 = vmatpush.msra.mxu0 %v28_v7 }
   0xb   :  { %8 = vsyncpa [#allocation3], 0  ;;  %v26_v11 = vld [vmem:[%s242_s1 + $0x48] sm:$0xff]  ;;  %80 = vmatpush.msra.mxu1 %v37_v8  ;;  %v35_v12 = vld [vmem:[%s242_s1 + $0x90] sm:$0xff]  ;;  %vm45_vm0 = vcmask 523264   ;;  %s136_s12 = smov [#allocation2]  }
   0xc   :  { %54 = vmatpush.msra.mxu0 %v27_v9  ;;  %v25_v13 = vld [vmem:[%s242_s1 + $0x40] sm:$0xff]  ;;  %v34_v14 = vld [vmem:[%s242_s1 + $0x88] sm:$0xff]  ;;  %v24_v15 = vld [vmem:[%s242_s1 + $0x38] sm:$0xff]  ;;  %s96_s13 = sshll.u32 %s136_s12, 4  ;;  %s98_s16 = sshll.u32 %s244_s3, 4  ;;  %vm89_vm1 = vcmask 261120   ;;  %s97_s13 = int_to_ptr.vmem [resolvable:$true] %s96_s13  ;;  %s99_s16 = int_to_ptr.hbm [resolvable:$true] %s98_s16 }
   0xd   :  { %81 = vmatpush.msra.mxu1 %v36_v10  ;;  %v33_v16 = vld [vmem:[%s242_s1 + $0x80] sm:$0xff]  ;;  %v23_v17 = vld [vmem:[%s242_s1 + $0x30] sm:$0xff]  ;;  %v16_v18 = vld [vmem:[%s241_s0 + $0x8] sm:$0xff] }
   0xe   :  { %55 = vmatpush.msra.mxu0 %v26_v11  ;;  %v22_v19 = vld [vmem:[%s242_s1 + $0x28] sm:$0xff]  ;;  %v21_v20 = vld [vmem:[%s242_s1 + $0x20] sm:$0xff]  ;;  %v20_v21 = vld [vmem:[%s242_s1 + $0x18] sm:$0xff] }
   0xf   :  { %82 = vmatpush.msra.mxu1 %v35_v12  ;;  %v19_v22 = vld [vmem:[%s242_s1 + $0x10] sm:$0xff]  ;;  %v18_v23 = vld [vmem:[%s242_s1 + $0x8] sm:$0xff]  ;;  %v17_v24 = vld [vmem:[%s242_s1] sm:$0xff] }
  0x10   :  { %56 = vmatpush.msra.mxu0 %v25_v13  ;;  %v15_v25 = vld [vmem:[%s241_s0] sm:$0xff] }
  0x11   :  { %83 = vmatpush.msra.mxu1 %v34_v14  ;;  %v109_v26 = vld [vmem:[%s243_s2] ss:$0 sm:$0xff] }
  0x12   :  { %57 = vmatpush.msra.mxu0 %v24_v15 }
  0x13   :  { %84 = vmatpush.msra.mxu1 %v33_v16 }
  0x14   :  { %58 = vmatpush.msra.mxu0 %v23_v17  ;;  %107 = vmatmul.msk.f32.vlgmr.msra.gmra.mxu1 %vm45_vm0, %v16_v18 }
  0x16   :  { %59 = vmatpush.msra.mxu0 %v22_v19 }
  0x18   :  { %60 = vmatpush.msra.mxu0 %v21_v20 }
  0x1a   :  { %61 = vmatpush.msra.mxu0 %v20_v21 }
  0x1c   :  { %62 = vmatpush.msra.mxu0 %v19_v22 }
  0x1e   :  { %63 = vmatpush.msra.mxu0 %v18_v23 }
  0x20   :  { %64 = vmatpush.msra.mxu0 %v17_v24 }
  0x21   :  { %65 = vmatmul.f32.vlgmr.msra.gmra.mxu0 %v15_v25 }
  0x91   :  { %v86_v28 = vpop.f32.mrf.mxu1 }
  0x9e   :  { %v66_v27 = vpop.f32.mrf.mxu0 }
  0x9f   :  { %v67_v29 = vadd.f32 %v109_v26, %v66_v27 }
  0xa1   :  { %v87_v30 = vadd.f32 %v86_v28, %v67_v29 }
  0xa3   :  { %90 = vst.msk [vmem:[#allocation2] sm:$0xff] %vm89_vm1, %v87_v30 }
  0xa4   :  { %101 = dma.vmem_to_hbm [thread:$0]  %s97_s13, 128, %s99_s16, [#allocation3]  }
  0xa5   :  { %134 = dma.done.wait [#allocation3], 128  }
  0xa6   :  { %135 = vsyncadd [#allocation3], 4294967168 }
  0xa7   :  { %106 = vsyncpa [#allocation3], 1 }

</bundles_post_ra>
